<compile_context>
chip_gen: v6e
topology: v6e:2x2x1
jax: 0.10.0
libtpu: 0.0.40
codegen_flags: <defaults>
</compile_context>

<pallas_src>
import functools
import numpy as np
import jax
import jax.numpy as jnp
from jax.experimental import pallas as pl
from jax.experimental.pallas import tpu as pltpu

_VMEM = pltpu.MemorySpace.VMEM
_MATMUL_DTYPE = jnp.float32   # set to jnp.bfloat16 on v6e/v7x for large graphs


# ---------------------------- Pallas kernel ----------------------------

def _sigmoid(x):
    return 1.0 / (1.0 + jnp.exp(-x))


def _softplus(x):
    # stable softplus: log(1 + exp(x)) = max(x, 0) + log(1 + exp(-|x|))
    return jnp.maximum(x, 0.0) + jnp.log(1.0 + jnp.exp(-jnp.abs(x)))


def _kgcr_fused_kernel(alpha, margin, batch,
                       p_ref, idx_ref,
                       id_emb_ref, user_pre_ref, item_pre_ref, attr_ref,
                       loss_ref, reg_ref):
    id_emb = id_emb_ref[...]
    user_pre = user_pre_ref[...]
    item_pre = item_pre_ref[...]
    attr = attr_ref[...]

    # Stacked propagation input X = [id_emb ; ia0 ; ua0]
    #   ia0 = [item_pre ; attribute],  ua0 = [user_pre ; attribute]
    x = jnp.concatenate([id_emb, item_pre, attr, user_pre, attr], axis=0)

    # All four propagations in one matmul:
    #   Y = [ui_rep ; ia_rep ; ua_rep ; hat_u] = P_big @ X
    y = jnp.dot(p_ref[...].astype(_MATMUL_DTYPE), x.astype(_MATMUL_DTYPE),
                preferred_element_type=jnp.float32)          # (n_rows, D)
    n_rows = y.shape[0]

    # Gather the 12*B needed rows of Y with a one-hot matmul (VMEM resident).
    # Row layout: first 6*B rows = "left" score operands, last 6*B = "right".
    idx = idx_ref[...]                                       # (12B, 1) int32
    iota = jax.lax.broadcasted_iota(jnp.int32, (idx.shape[0], n_rows), 1)
    sel = (iota == idx).astype(_MATMUL_DTYPE)                # (12B, n_rows)
    g = jnp.dot(sel, y.astype(_MATMUL_DTYPE),
                preferred_element_type=jnp.float32)          # (12B, D)

    half = 6 * batch
    scores = jnp.sum(g[:half] * g[half:], axis=1, keepdims=True)   # (6B, 1)

    cf_pos = scores[0 * batch:1 * batch]
    cf_neg = scores[1 * batch:2 * batch]
    kg_pos = scores[2 * batch:3 * batch]
    kg_neg = scores[3 * batch:4 * batch]
    hat_pos = scores[4 * batch:5 * batch]
    hat_neg = scores[5 * batch:6 * batch]

    sig_hp = _sigmoid(hat_pos)
    sig_hn = _sigmoid(hat_neg)

    z = cf_pos + kg_pos * sig_hp - cf_neg - kg_neg * sig_hn
    # loss1 = -mean(log(sigmoid(z))) in the numerically safe softplus form
    loss1 = jnp.mean(_softplus(-z), keepdims=True)
    loss2 = jnp.mean(jnp.maximum(sig_hp - sig_hn - margin, 0.0), keepdims=True)
    loss_ref[...] = loss1 + alpha * loss2

    reg_ref[...] = (jnp.sum(id_emb * id_emb, keepdims=True) / id_emb.size
                    + jnp.sum(user_pre * user_pre, keepdims=True) / user_pre.size
                    + jnp.sum(item_pre * item_pre, keepdims=True) / item_pre.size)


# ---------------------------- forward wrapper ----------------------------

def kgcr_forward(params, p_big, user_tensor, item_tensor,
                 num_u, num_i, num_a, alpha, margin):
    B = int(user_tensor.shape[0])
    u_pos, u_neg = user_tensor[:, 0], user_tensor[:, 1]
    i_pos, i_neg = item_tensor[:, 0], item_tensor[:, 1]

    # Row offsets of the four blocks inside Y = P_big @ X.
    ia_off = num_u + num_i
    ua_off = ia_off + num_i + num_a
    hat_off = ua_off + num_u + num_a

    ia_pos = i_pos - num_u + ia_off
    ia_neg = i_neg - num_u + ia_off
    left = [u_pos, u_neg,                      # ui_rep[user]  (cf)
            u_pos + ua_off, u_neg + ua_off,    # ua_rep[user]  (kg)
            u_pos + hat_off, u_neg + hat_off]  # hat_u[user]   (hat)
    right = [i_pos, i_neg,                     # ui_rep[item]  (cf)
             ia_pos, ia_neg,                   # ia_rep[item]  (kg)
             ia_pos, ia_neg]                   # ia_rep[item]  (hat, = all_hat_i_pre)
    sel_idx = jnp.concatenate(left + right).astype(jnp.int32).reshape(12 * B, 1)

    kernel = functools.partial(_kgcr_fused_kernel,
                               float(alpha), float(margin), B)
    full = pl.BlockSpec(memory_space=_VMEM)
    loss, reg = pl.pallas_call(
        kernel,
        out_shape=(jax.ShapeDtypeStruct((1, 1), jnp.float32),
                   jax.ShapeDtypeStruct((1, 1), jnp.float32)),
        in_specs=[full] * 6,
        out_specs=(full, full),
    )(p_big, sel_idx,
      params["id_embedding"], params["user_pre"],
      params["item_pre"], params["attribute"])
    return loss[0, 0], reg[0, 0]


# ---------------------------- graph glue (numpy, static setup) ----------------------------

def edge_index_gen(data):
    e = np.asarray(data, dtype=np.int64).T            # (2, E)
    e = np.concatenate([e, e[::-1]], axis=1)          # add reversed edges
    mask = e[0] != e[1]                               # remove self-loops
    return e[:, mask]


def build_norm_adj(edge_index, num_node):
    # PyG GCN: out[edge[1]] += dinv[edge[0]]*dinv[edge[1]] * x[edge[0]]
    row, col = edge_index
    deg = np.zeros(num_node, np.float32)
    np.add.at(deg, row, 1.0)
    dinv = np.where(deg > 0, deg ** -0.5, 0.0).astype(np.float32)
    norm = dinv[row] * dinv[col]
    A = np.zeros((num_node, num_node), np.float32)
    np.add.at(A, (col, row), norm)
    return A


def build_mean_adj(edge_index, num_node):
    # scatter_('mean', x[edge_index[1]], edge_index[0]) as row-normalized matrix
    M = np.zeros((num_node, num_node), np.float32)
    np.add.at(M, (edge_index[0], edge_index[1]), 1.0)
    rs = M.sum(axis=1, keepdims=True)
    return M / np.maximum(rs, 1.0)


def build_propagation_matrix(A_ui, A_ia, A_ua, M_ua, num_u, num_i, num_a):
    """Block matrix mapping X = [id_emb ; ia0 ; ua0] -> [ui_rep; ia_rep; ua_rep; hat_u]."""
    nui, nia, nua = num_u + num_i, num_i + num_a, num_u + num_a
    P_ui = (np.eye(nui, dtype=np.float32) + A_ui + A_ui @ A_ui
            + A_ui @ A_ui @ A_ui) / 4.0
    P_ia = (np.eye(nia, dtype=np.float32) + A_ia) / 2.0
    P_ua = (np.eye(nua, dtype=np.float32) + A_ua) / 2.0
    P = np.zeros((nui + nia + 2 * nua, nui + nia + nua), np.float32)
    r = 0
    P[r:r + nui, 0:nui] = P_ui;              r += nui
    P[r:r + nia, nui:nui + nia] = P_ia;      r += nia
    P[r:r + nua, nui + nia:] = P_ua;         r += nua
    P[r:r + nua, nui + nia:] = M_ua          # hat_u = M_ua @ ua0
    return jnp.asarray(P)


# pure-JAX reference (mirrors the PyTorch forward) for a correctness check
def kgcr_forward_ref(params, adjs, user_tensor, item_tensor, num_u, alpha, margin):
    A_ui, A_ia, A_ua, M_ua = adjs
    id_emb = params["id_embedding"]
    r1 = A_ui @ id_emb
    r2 = A_ui @ r1
    r3 = A_ui @ r2
    ui_rep = (id_emb + r1 + r2 + r3) / 4
    ia0 = jnp.concatenate([params["item_pre"], params["attribute"]], 0)
    ia_rep = (ia0 + A_ia @ ia0) / 2
    ua0 = jnp.concatenate([params["user_pre"], params["attribute"]], 0)
    ua_rep = (ua0 + A_ua @ ua0) / 2
    hat_u = M_ua @ ua0
    ut = user_tensor.reshape(-1)
    it = item_tensor.reshape(-1)
    sig = jax.nn.sigmoid
    cf = jnp.sum(ui_rep[ut] * ui_rep[it], axis=1).reshape(-1, 2)
    kg = jnp.sum(ua_rep[ut] * ia_rep[it - num_u], axis=1).reshape(-1, 2)
    hat = jnp.sum(hat_u[ut] * ia_rep[it - num_u], axis=1).reshape(-1, 2)
    kg_pos = kg[:, 0] * sig(hat[:, 0])
    kg_neg = kg[:, 1] * sig(hat[:, 1])
    loss1 = -jnp.mean(jnp.log(sig(cf[:, 0] + kg_pos - cf[:, 1] - kg_neg)))
    loss2 = jnp.mean(jnp.maximum(sig(hat[:, 0]) - sig(hat[:, 1]) - margin, 0.0))
    loss = loss1 + alpha * loss2
    reg = (jnp.mean(id_emb ** 2) + jnp.mean(params["user_pre"] ** 2)
           + jnp.mean(params["item_pre"] ** 2))
    return loss, reg


if __name__ == "__main__":
    num_u, num_i, num_a, dim_E, B = 8, 8, 8, 128, 8
    alpha, margin = 0.5, 0.1

    # deterministic synthetic edge lists (user-item, item-attr, user-attr)
    ui_data = [(u, num_u + (u * 3 + k) % num_i) for u in range(num_u) for k in range(2)]
    ia_data = [(i, num_i + (i + k) % num_a) for i in range(num_i) for k in range(2)]
    ua_data = [(u, num_u + (u * 2 + k) % num_a) for u in range(num_u) for k in range(2)]

    A_ui = build_norm_adj(edge_index_gen(ui_data), num_u + num_i)
    A_ia = build_norm_adj(edge_index_gen(ia_data), num_i + num_a)
    ua_edge = edge_index_gen(ua_data)
    A_ua = build_norm_adj(ua_edge, num_u + num_a)
    M_ua = build_mean_adj(ua_edge, num_u + num_a)

    p_big = build_propagation_matrix(A_ui, A_ia, A_ua, M_ua, num_u, num_i, num_a)
    adjs = tuple(jnp.asarray(a) for a in (A_ui, A_ia, A_ua, M_ua))

    key = jax.random.PRNGKey(0)
    k0, k1, k2, k3, k4, k5 = jax.random.split(key, 6)

    def xavier(k, shape):
        std = float(np.sqrt(2.0 / (shape[0] + shape[1])))
        return jax.random.normal(k, shape, jnp.float32) * std

    params = {
        "id_embedding": xavier(k0, (num_u + num_i, dim_E)),
        "user_pre": xavier(k1, (num_u, dim_E)),
        "item_pre": xavier(k2, (num_i, dim_E)),
        "attribute": xavier(k3, (num_a, dim_E)),
    }
    # TODO(synk): self.trans_mlp (nn.Linear) is never used in forward; not implemented.

    users = jax.random.randint(k4, (B,), 0, num_u)
    user_tensor = jnp.stack([users, users], axis=1)                     # (B, 2) [pos, neg]
    item_tensor = jax.random.randint(k5, (B, 2), num_u, num_u + num_i)  # (B, 2) [pos, neg]

    fwd = jax.jit(functools.partial(kgcr_forward, num_u=num_u, num_i=num_i,
                                    num_a=num_a, alpha=alpha, margin=margin))
    loss, reg = fwd(params, p_big, user_tensor, item_tensor)
    loss, reg = jax.block_until_ready((loss, reg))

    loss_ref, reg_ref = kgcr_forward_ref(params, adjs, user_tensor, item_tensor,
                                         num_u, alpha, margin)
    assert np.isfinite(float(loss)) and np.isfinite(float(reg))
    np.testing.assert_allclose(float(loss), float(loss_ref), rtol=2e-3, atol=2e-4)
    np.testing.assert_allclose(float(reg), float(reg_ref), rtol=2e-3, atol=2e-4)
    print("KERNEL_OK")
</pallas_src>

<mosaic_0001>
module attributes {stable_mosaic.version = 11 : i64} {
  func.func @_kgcr_fused_kernel(%arg0: memref<64x48xf32, #tpu.memory_space<vmem>>, %arg1: memref<96x1xi32, #tpu.memory_space<vmem>>, %arg2: memref<16x128xf32, #tpu.memory_space<vmem>>, %arg3: memref<8x128xf32, #tpu.memory_space<vmem>>, %arg4: memref<8x128xf32, #tpu.memory_space<vmem>>, %arg5: memref<8x128xf32, #tpu.memory_space<vmem>>, %arg6: memref<1x1xf32, #tpu.memory_space<vmem>>, %arg7: memref<1x1xf32, #tpu.memory_space<vmem>>) attributes {dimension_semantics = [], scalar_prefetch = 0 : i64, scratch_operands = 0 : i64, tpu.core_type = #tpu.core_type<tc>} {
    %c0 = arith.constant 0 : index
    %c0_0 = arith.constant 0 : index
    %0 = vector.load %arg2[%c0, %c0_0] : memref<16x128xf32, #tpu.memory_space<vmem>>, vector<16x128xf32>
    %c0_1 = arith.constant 0 : index
    %c0_2 = arith.constant 0 : index
    %1 = vector.load %arg3[%c0_1, %c0_2] : memref<8x128xf32, #tpu.memory_space<vmem>>, vector<8x128xf32>
    %c0_3 = arith.constant 0 : index
    %c0_4 = arith.constant 0 : index
    %2 = vector.load %arg4[%c0_3, %c0_4] : memref<8x128xf32, #tpu.memory_space<vmem>>, vector<8x128xf32>
    %c0_5 = arith.constant 0 : index
    %c0_6 = arith.constant 0 : index
    %3 = vector.load %arg5[%c0_5, %c0_6] : memref<8x128xf32, #tpu.memory_space<vmem>>, vector<8x128xf32>
    %4 = tpu.concatenate %0, %2, %3, %1, %3 in 0 : vector<16x128xf32>, vector<8x128xf32>, vector<8x128xf32>, vector<8x128xf32>, vector<8x128xf32> -> vector<48x128xf32>
    %c0_7 = arith.constant 0 : index
    %c0_8 = arith.constant 0 : index
    %5 = vector.load %arg0[%c0_7, %c0_8] : memref<64x48xf32, #tpu.memory_space<vmem>>, vector<64x48xf32>
    %cst = arith.constant dense<0.000000e+00> : vector<64x128xf32>
    %6 = tpu.matmul %5, %4, %cst {dimension_numbers = #tpu.dot_dimension_numbers<[1], [0], [0], [1], [0, 0, 1, 1], [], []>} : vector<64x48xf32>, vector<48x128xf32>, vector<64x128xf32> -> vector<64x128xf32>
    %c0_9 = arith.constant 0 : index
    %c0_10 = arith.constant 0 : index
    %7 = vector.load %arg1[%c0_9, %c0_10] : memref<96x1xi32, #tpu.memory_space<vmem>>, vector<96x1xi32>
    %8 = tpu.iota {dimensions = array<i32: 1>} : vector<96x64xi32>
    %9 = vector.broadcast %7 : vector<96x1xi32> to vector<96x64xi32>
    %10 = arith.cmpi eq, %8, %9 : vector<96x64xi32>
    %11 = arith.extui %10 : vector<96x64xi1> to vector<96x64xi32>
    %12 = arith.sitofp %11 : vector<96x64xi32> to vector<96x64xf32>
    %cst_11 = arith.constant dense<0.000000e+00> : vector<96x128xf32>
    %13 = tpu.matmul %12, %6, %cst_11 {dimension_numbers = #tpu.dot_dimension_numbers<[1], [0], [0], [1], [0, 0, 1, 1], [], []>} : vector<96x64xf32>, vector<64x128xf32>, vector<96x128xf32> -> vector<96x128xf32>
    %14 = vector.extract_strided_slice %13 {offsets = [0, 0], sizes = [48, 128], strides = [1, 1]} : vector<96x128xf32> to vector<48x128xf32>
    %15 = vector.extract_strided_slice %13 {offsets = [48, 0], sizes = [48, 128], strides = [1, 1]} : vector<96x128xf32> to vector<48x128xf32>
    %16 = arith.mulf %14, %15 : vector<48x128xf32>
    %cst_12 = arith.constant dense<0.000000e+00> : vector<48xf32>
    %17 = vector.multi_reduction <add>, %16, %cst_12 [1] : vector<48x128xf32> to vector<48xf32>
    %18 = vector.shape_cast %17 : vector<48xf32> to vector<48x1xf32>
    %19 = vector.extract_strided_slice %18 {offsets = [0, 0], sizes = [8, 1], strides = [1, 1]} : vector<48x1xf32> to vector<8x1xf32>
    %20 = vector.extract_strided_slice %18 {offsets = [8, 0], sizes = [8, 1], strides = [1, 1]} : vector<48x1xf32> to vector<8x1xf32>
    %21 = vector.extract_strided_slice %18 {offsets = [16, 0], sizes = [8, 1], strides = [1, 1]} : vector<48x1xf32> to vector<8x1xf32>
    %22 = vector.extract_strided_slice %18 {offsets = [24, 0], sizes = [8, 1], strides = [1, 1]} : vector<48x1xf32> to vector<8x1xf32>
    %23 = vector.extract_strided_slice %18 {offsets = [32, 0], sizes = [8, 1], strides = [1, 1]} : vector<48x1xf32> to vector<8x1xf32>
    %24 = vector.extract_strided_slice %18 {offsets = [40, 0], sizes = [8, 1], strides = [1, 1]} : vector<48x1xf32> to vector<8x1xf32>
    %cst_13 = arith.constant 0.000000e+00 : f32
    %25 = vector.broadcast %cst_13 : f32 to vector<8x1xf32>
    %26 = arith.subf %25, %23 : vector<8x1xf32>
    %27 = math.exp %26 : vector<8x1xf32>
    %cst_14 = arith.constant 1.000000e+00 : f32
    %28 = vector.broadcast %cst_14 : f32 to vector<8x1xf32>
    %29 = arith.addf %28, %27 : vector<8x1xf32>
    %cst_15 = arith.constant 1.000000e+00 : f32
    %30 = vector.broadcast %cst_15 : f32 to vector<8x1xf32>
    %31 = arith.divf %30, %29 : vector<8x1xf32>
    %cst_16 = arith.constant 0.000000e+00 : f32
    %32 = vector.broadcast %cst_16 : f32 to vector<8x1xf32>
    %33 = arith.subf %32, %24 : vector<8x1xf32>
    %34 = math.exp %33 : vector<8x1xf32>
    %cst_17 = arith.constant 1.000000e+00 : f32
    %35 = vector.broadcast %cst_17 : f32 to vector<8x1xf32>
    %36 = arith.addf %35, %34 : vector<8x1xf32>
    %cst_18 = arith.constant 1.000000e+00 : f32
    %37 = vector.broadcast %cst_18 : f32 to vector<8x1xf32>
    %38 = arith.divf %37, %36 : vector<8x1xf32>
    %39 = arith.mulf %21, %31 : vector<8x1xf32>
    %40 = arith.addf %19, %39 : vector<8x1xf32>
    %41 = arith.subf %40, %20 : vector<8x1xf32>
    %42 = arith.mulf %22, %38 : vector<8x1xf32>
    %43 = arith.subf %41, %42 : vector<8x1xf32>
    %cst_19 = arith.constant 0.000000e+00 : f32
    %44 = vector.broadcast %cst_19 : f32 to vector<8x1xf32>
    %45 = arith.subf %44, %43 : vector<8x1xf32>
    %cst_20 = arith.constant 0.000000e+00 : f32
    %46 = vector.broadcast %cst_20 : f32 to vector<8x1xf32>
    %47 = arith.maximumf %45, %46 : vector<8x1xf32>
    %48 = math.absf %45 : vector<8x1xf32>
    %cst_21 = arith.constant 0.000000e+00 : f32
    %49 = vector.broadcast %cst_21 : f32 to vector<8x1xf32>
    %50 = arith.subf %49, %48 : vector<8x1xf32>
    %51 = math.exp %50 : vector<8x1xf32>
    %cst_22 = arith.constant 1.000000e+00 : f32
    %52 = vector.broadcast %cst_22 : f32 to vector<8x1xf32>
    %53 = arith.addf %52, %51 : vector<8x1xf32>
    %54 = math.log %53 : vector<8x1xf32>
    %55 = arith.addf %47, %54 : vector<8x1xf32>
    %56 = vector.shape_cast %55 : vector<8x1xf32> to vector<1x8x1xf32>
    %cst_23 = arith.constant dense<0.000000e+00> : vector<1xf32>
    %57 = vector.multi_reduction <add>, %56, %cst_23 [1, 2] : vector<1x8x1xf32> to vector<1xf32>
    %58 = vector.shape_cast %57 : vector<1xf32> to vector<1x1x1xf32>
    %59 = vector.extract %58[0, 0, 0] : f32 from vector<1x1x1xf32>
    %60 = vector.broadcast %59 : f32 to vector<1x1xf32>
    %cst_24 = arith.constant 8.000000e+00 : f32
    %61 = vector.broadcast %cst_24 : f32 to vector<1x1xf32>
    %62 = arith.divf %60, %61 : vector<1x1xf32>
    %63 = arith.subf %31, %38 : vector<8x1xf32>
    %cst_25 = arith.constant 1.000000e-01 : f32
    %64 = vector.broadcast %cst_25 : f32 to vector<8x1xf32>
    %65 = arith.subf %63, %64 : vector<8x1xf32>
    %cst_26 = arith.constant 0.000000e+00 : f32
    %66 = vector.broadcast %cst_26 : f32 to vector<8x1xf32>
    %67 = arith.maximumf %65, %66 : vector<8x1xf32>
    %68 = vector.shape_cast %67 : vector<8x1xf32> to vector<1x8x1xf32>
    %cst_27 = arith.constant dense<0.000000e+00> : vector<1xf32>
    %69 = vector.multi_reduction <add>, %68, %cst_27 [1, 2] : vector<1x8x1xf32> to vector<1xf32>
    %70 = vector.shape_cast %69 : vector<1xf32> to vector<1x1x1xf32>
    %71 = vector.extract %70[0, 0, 0] : f32 from vector<1x1x1xf32>
    %72 = vector.broadcast %71 : f32 to vector<1x1xf32>
    %cst_28 = arith.constant 8.000000e+00 : f32
    %73 = vector.broadcast %cst_28 : f32 to vector<1x1xf32>
    %74 = arith.divf %72, %73 : vector<1x1xf32>
    %cst_29 = arith.constant 5.000000e-01 : f32
    %75 = vector.broadcast %cst_29 : f32 to vector<1x1xf32>
    %76 = arith.mulf %75, %74 : vector<1x1xf32>
    %77 = arith.addf %62, %76 : vector<1x1xf32>
    %c0_30 = arith.constant 0 : index
    %c0_31 = arith.constant 0 : index
    %78 = vector.load %arg6[%c0_30, %c0_31] : memref<1x1xf32, #tpu.memory_space<vmem>>, vector<1x1xf32>
    tpu.vector_store %arg6[%c0_30, %c0_31], %77 {strides = array<i32>} : memref<1x1xf32, #tpu.memory_space<vmem>>, vector<1x1xf32>,
    %79 = arith.mulf %0, %0 : vector<16x128xf32>
    %80 = vector.shape_cast %79 : vector<16x128xf32> to vector<1x16x128xf32>
    %cst_32 = arith.constant dense<0.000000e+00> : vector<1xf32>
    %81 = vector.multi_reduction <add>, %80, %cst_32 [1, 2] : vector<1x16x128xf32> to vector<1xf32>
    %82 = vector.shape_cast %81 : vector<1xf32> to vector<1x1x1xf32>
    %83 = vector.extract %82[0, 0, 0] : f32 from vector<1x1x1xf32>
    %84 = vector.broadcast %83 : f32 to vector<1x1xf32>
    %cst_33 = arith.constant 2.048000e+03 : f32
    %85 = vector.broadcast %cst_33 : f32 to vector<1x1xf32>
    %86 = arith.divf %84, %85 : vector<1x1xf32>
    %87 = arith.mulf %1, %1 : vector<8x128xf32>
    %88 = vector.shape_cast %87 : vector<8x128xf32> to vector<1x8x128xf32>
    %cst_34 = arith.constant dense<0.000000e+00> : vector<1xf32>
    %89 = vector.multi_reduction <add>, %88, %cst_34 [1, 2] : vector<1x8x128xf32> to vector<1xf32>
    %90 = vector.shape_cast %89 : vector<1xf32> to vector<1x1x1xf32>
    %91 = vector.extract %90[0, 0, 0] : f32 from vector<1x1x1xf32>
    %92 = vector.broadcast %91 : f32 to vector<1x1xf32>
    %cst_35 = arith.constant 1.024000e+03 : f32
    %93 = vector.broadcast %cst_35 : f32 to vector<1x1xf32>
    %94 = arith.divf %92, %93 : vector<1x1xf32>
    %95 = arith.addf %86, %94 : vector<1x1xf32>
    %96 = arith.mulf %2, %2 : vector<8x128xf32>
    %97 = vector.shape_cast %96 : vector<8x128xf32> to vector<1x8x128xf32>
    %cst_36 = arith.constant dense<0.000000e+00> : vector<1xf32>
    %98 = vector.multi_reduction <add>, %97, %cst_36 [1, 2] : vector<1x8x128xf32> to vector<1xf32>
    %99 = vector.shape_cast %98 : vector<1xf32> to vector<1x1x1xf32>
    %100 = vector.extract %99[0, 0, 0] : f32 from vector<1x1x1xf32>
    %101 = vector.broadcast %100 : f32 to vector<1x1xf32>
    %cst_37 = arith.constant 1.024000e+03 : f32
    %102 = vector.broadcast %cst_37 : f32 to vector<1x1xf32>
    %103 = arith.divf %101, %102 : vector<1x1xf32>
    %104 = arith.addf %95, %103 : vector<1x1xf32>
    %c0_38 = arith.constant 0 : index
    %c0_39 = arith.constant 0 : index
    %105 = vector.load %arg7[%c0_38, %c0_39] : memref<1x1xf32, #tpu.memory_space<vmem>>, vector<1x1xf32>
    tpu.vector_store %arg7[%c0_38, %c0_39], %104 {strides = array<i32>} : memref<1x1xf32, #tpu.memory_space<vmem>>, vector<1x1xf32>,
    return
  }
}

</mosaic_0001>

<bundles_post_ra>
// kernel: kgcr_forward.1
= control target key start
LH: loop header
LB: loop body
LE: loop exit
PB: predicated region body
PF: predicated region fallthrough
CT: control target
= control target key end

     0   :  { %13 = vsyncpa [#allocation3], 0  ;;  %vm40_vm0 = vcmask 392192   ;;  %v780_v3 = vmov 0   ;;  %s968_s0 = inlined_call_operand.vmem [shape: f32[64,48], index: 0, kind: input, shape index: {}]   ;;  %s969_s1 = inlined_call_operand.vmem [shape: s32[96,1], index: 1, kind: input, shape index: {}]   ;;  %s970_s2 = inlined_call_operand.vmem [shape: f32[16,128], index: 2, kind: input, shape index: {}]   ;;  %s971_s3 = inlined_call_operand.vmem [shape: f32[8,128], index: 3, kind: input, shape index: {}]   ;;  %s972_s4 = inlined_call_operand.vmem [shape: f32[8,128], index: 4, kind: input, shape index: {}]   ;;  %s973_s5 = inlined_call_operand.vmem [shape: f32[8,128], index: 5, kind: input, shape index: {}]   ;;  %s974_s6 = inlined_call_operand.hbm [shape: f32[1,1], index: 6, kind: output, shape index: {0}]   ;;  %s975_s7 = inlined_call_operand.hbm [shape: f32[1,1], index: 7, kind: output, shape index: {1}]  }
   0x1   :  { %v31_v0 = vld [vmem:[%s973_s5] sm:$0xff]  ;;  %722 = vset.pattern.permute.xlu0 %v780_v3  ;;  %723 = vset.pattern.permute.xlu1 %v780_v3  ;;  %v172_v5 = vld [vmem:[%s969_s1 + $0x10] sm:$0xff]  ;;  %v852_v7 = vld [vmem:[%s970_s2 + $0x8] sm:$0xff] }
   0x2   :  { %v830_v1 = vld [vmem:[%s971_s3] sm:$0xff]  ;;  %634 = vmatprep.subr.mxu0 %v31_v0  ;;  %191 = vperm.xlu0 %722, %v172_v5   ;;  %v173_v8 = vld [vmem:[%s969_s1 + $0x18] sm:$0xff]  ;;  %v175_v9 = vld [vmem:[%s969_s1 + $0x28] sm:$0xff] }
   0x3   :  { %v32_v2 = vld [vmem:[%s968_s0] sm:$0xff]  ;;  %635 = vmatpush3.msra.mxu0 %v31_v0 }
   0x4   :  { %646 = vmatprep.mubr.msk.f32.mxu0 %vm40_vm0, %v32_v2  ;;  %636 = vmatprep.subr.mxu0 %v830_v1  ;;  %v841_v4 = vld [vmem:[%s972_s4] sm:$0xff] }
   0x5   :  { %637 = vmatpush3.msra.mxu0 %v830_v1  ;;  %v174_v6 = vld [vmem:[%s969_s1 + $0x20] sm:$0xff] }
   0x6   :  { %638 = vmatprep.subr.mxu0 %v31_v0  ;;  %197 = vperm.xlu1 %723, %v174_v6   ;;  %v865_v10 = vld [vmem:[%s970_s2] sm:$0xff] }
   0x7   :  { %639 = vmatpush3.msra.mxu0 %v31_v0 }
   0x8   :  { %640 = vmatprep.subr.mxu0 %v841_v4 }
   0x9   :  { %641 = vmatpush3.msra.mxu0 %v841_v4 }
   0xa   :  { %14 = vsyncpa [#allocation5], 0  ;;  %642 = vmatprep.subr.mxu0 %v852_v7  ;;  %194 = vperm.xlu0 %722, %v173_v8   ;;  %v33_v11 = vld [vmem:[%s968_s0 + $0x8] sm:$0xff]  ;;  %v176_v12 = vld [vmem:[%s969_s1 + $0x30] sm:$0xff]  ;;  %v182_v26 = vlaneseq  ;;  %vm256_vm1 = vcmask 523264   ;;  %v781_v30 = vmov 0.0  }
   0xb   :  { %643 = vmatpush3.msra.mxu0 %v852_v7  ;;  %200 = vperm.xlu1 %723, %v175_v9   ;;  %v34_v13 = vld [vmem:[%s968_s0 + $0x10] sm:$0xff]  ;;  %v177_v14 = vld [vmem:[%s969_s1 + $0x38] sm:$0xff]  ;;  %v178_v16 = vld [vmem:[%s969_s1 + $0x40] sm:$0xff]  ;;  %vm463_vm14 = vcmask 7168   ;;  %s782_s23 = smov [#allocation2]   ;;  %vm494_vm15 = vcmask 0  }
   0xc   :  { %644 = vmatprep.subr.mxu0 %v865_v10  ;;  %v35_v15 = vld [vmem:[%s968_s0 + $0x18] sm:$0xff]  ;;  %v36_v17 = vld [vmem:[%s968_s0 + $0x20] sm:$0xff]  ;;  %v179_v18 = vld [vmem:[%s969_s1 + $0x48] sm:$0xff]  ;;  %v183_v27 = vand.u32 127, %v182_v26  ;;  %s545_s24 = sshll.u32 %s782_s23, 4  ;;  %s783_s25 = smov [#allocation4]   ;;  %s546_s24 = int_to_ptr.vmem [resolvable:$true] %s545_s24 }
   0xd   :  { %645 = vmatpush3.msra.mxu0 %v865_v10  ;;  %v37_v19 = vld [vmem:[%s968_s0 + $0x28] sm:$0xff]  ;;  %v180_v20 = vld [vmem:[%s969_s1 + $0x50] sm:$0xff]  ;;  %v181_v22 = vld [vmem:[%s969_s1 + $0x58] sm:$0xff]  ;;  %s555_s26 = sshll.u32 %s783_s25, 4  ;;  %s736_s27 = scalar_lea.vmem %s546_s24, 16  ;;  %s556_s26 = int_to_ptr.vmem [resolvable:$true] %s555_s26 }
   0xe   :  { %647 = vmatmul.mubr.msk.f32.vlgmr.msra.gmra.mxu0 %vm40_vm0, %v33_v11  ;;  %203 = vperm.xlu0 %722, %v176_v12   ;;  %v38_v21 = vld [vmem:[%s968_s0 + $0x30] sm:$0xff]  ;;  %v39_v23 = vld [vmem:[%s968_s0 + $0x38] sm:$0xff]  ;;  %v170_v24 = vld [vmem:[%s969_s1] sm:$0xff]  ;;  %p737_p0 = scmp.ne.s32.totalorder %s546_s24, %s736_s27  ;;  %s740_s28 = scalar_lea.vmem %s546_s24, 32 }
   0xf   :  { %649 = vmatprep.mubr.msk.f32.mxu0 %vm40_vm0, %v34_v13  ;;  %206 = vperm.xlu1 %723, %v177_v14   ;;  %v171_v25 = vld [vmem:[%s969_s1 + $0x8] sm:$0xff]  ;;  %p741_p1 = scmp.lt.s32.totalorder %s546_s24, %s546_s24  ;;  %p742_p2 = scmp.lt.s32.totalorder %s740_s28, %s736_s27 }
  0x11   :  { %p743_p3 = por %p742_p2, %p741_p1 }
  0x12   :  { %650 = vmatmul.mubr.msk.f32.gmra.mxu0 %vm40_vm0, %v35_v15  ;;  %209 = vperm.xlu0 %722, %v178_v16  }
  0x13   :  { %652 = vmatprep.mubr.msk.f32.mxu0 %vm40_vm0, %v36_v17  ;;  %212 = vperm.xlu1 %723, %v179_v18   ;;  %p744_p4 = pnand %p743_p3, %p737_p0 }
  0x16   :  { %653 = vmatmul.mubr.msk.f32.gmra.mxu0 %vm40_vm0, %v37_v19  ;;  %215 = vperm.xlu0 %722, %v180_v20   ;;  %v496_v19 = vmul.f32 %v865_v10, %v865_v10  ;;  %v497_v20 = vmul.f32 %v852_v7, %v852_v7 }
  0x17   :  { %655 = vmatprep.mubr.msk.f32.mxu0 %vm40_vm0, %v38_v21  ;;  %218 = vperm.xlu1 %723, %v181_v22  }
  0x18   :  { %v498_v21 = vadd.f32 %v497_v20, %v496_v19 }
  0x1a   :  { %656 = vmatmul.mubr.msk.f32.gmra.mxu0 %vm40_vm0, %v39_v23  ;;  %185 = vperm.xlu0 %722, %v170_v24  }
  0x1b   :  { %188 = vperm.xlu1 %723, %v171_v25  }
  0x7d   :  { %v192_v28 = vpop.permute.xlu0 %191 }
  0x7e   :  { %vm222_vm2 = vcmp.eq.s32.totalorder %v183_v27, %v192_v28 }
  0x7f   :  { %v577_v31 = vsel %vm222_vm2, 1.0, %v781_v30 }
  0x80   :  { %677 = vmatprep.mubr.msk.f32.mxu1 %vm256_vm1, %v577_v31 }
  0x81   :  { %v198_v29 = vpop.permute.xlu1 %197 }
  0x82   :  { %vm224_vm3 = vcmp.eq.s32.totalorder %v183_v27, %v198_v29 }
  0x83   :  { %v923_v32 = vsel %vm224_vm3, 1.0, %v781_v30 }
  0x85   :  { %v195_v33 = vpop.permute.xlu0 %194 }
  0x86   :  { %vm223_vm4 = vcmp.eq.s32.totalorder %v183_v27, %v195_v33  ;;  %v201_v34 = vpop.permute.xlu1 %200 }
  0x87   :  { %v926_v35 = vsel %vm223_vm4, 1.0, %v781_v30  ;;  %vm225_vm5 = vcmp.eq.s32.totalorder %v183_v27, %v201_v34 }
  0x88   :  { %v928_v36 = vsel %vm225_vm5, 1.0, %v781_v30 }
  0x89   :  { %v204_v37 = vpop.permute.xlu0 %203 }
  0x8a   :  { %vm226_vm6 = vcmp.eq.s32.totalorder %v183_v27, %v204_v37  ;;  %v207_v38 = vpop.permute.xlu1 %206 }
  0x8b   :  { %v930_v39 = vsel %vm226_vm6, 1.0, %v781_v30  ;;  %vm227_vm7 = vcmp.eq.s32.totalorder %v183_v27, %v207_v38 }
  0x8c   :  { %v932_v40 = vsel %vm227_vm7, 1.0, %v781_v30 }
  0x8d   :  { %v210_v41 = vpop.permute.xlu0 %209 }
  0x8e   :  { %vm228_vm8 = vcmp.eq.s32.totalorder %v183_v27, %v210_v41  ;;  %v213_v42 = vpop.permute.xlu1 %212 }
  0x8f   :  { %v583_v43 = vsel %vm228_vm8, 1.0, %v781_v30  ;;  %vm229_vm9 = vcmp.eq.s32.totalorder %v183_v27, %v213_v42 }
  0x90   :  { %v584_v44 = vsel %vm229_vm9, 1.0, %v781_v30 }
  0x91   :  { %v216_v45 = vpop.permute.xlu0 %215 }
  0x92   :  { %vm230_vm10 = vcmp.eq.s32.totalorder %v183_v27, %v216_v45  ;;  %v219_v46 = vpop.permute.xlu1 %218  ;;  %v511_v45 = vmul.f32 %v830_v1, %v830_v1 }
  0x93   :  { %v585_v47 = vsel %vm230_vm10, 1.0, %v781_v30  ;;  %vm231_vm11 = vcmp.eq.s32.totalorder %v183_v27, %v219_v46 }
  0x94   :  { %v586_v48 = vsel %vm231_vm11, 1.0, %v781_v30 }
  0x95   :  { %v186_v49 = vpop.permute.xlu0 %185 }
  0x96   :  { %vm220_vm12 = vcmp.eq.s32.totalorder %v183_v27, %v186_v49  ;;  %v189_v50 = vpop.permute.xlu1 %188 }
  0x97   :  { %v575_v51 = vsel %vm220_vm12, 1.0, %v781_v30  ;;  %vm221_vm13 = vcmp.eq.s32.totalorder %v183_v27, %v189_v50 }
  0x98   :  { %674 = vmatprep.mubr.msk.f32.mxu0 %vm256_vm1, %v575_v51  ;;  %v576_v52 = vsel %vm221_vm13, 1.0, %v781_v30 }
  0xce   :  { %v648_v53 = vpop.f32.mrf.mxu0 }
  0xd0   :  { %v131_v54 = vpop.f32.mrf.mxu0 }
  0xd2   :  { %v651_v55 = vpop.f32.mrf.mxu0 }
  0xd4   :  { %v141_v56 = vpop.f32.mrf.mxu0 }
  0xd6   :  { %v654_v57 = vpop.f32.mrf.mxu0 }
  0xd8   :  { %v151_v58 = vpop.f32.mrf.mxu0 }
  0xda   :  { %v657_v59 = vpop.f32.mrf.mxu0 }
  0xdb   :  { %658 = vmatprep.subr.mxu0 %v657_v59  ;;  %692 = vmatprep.subr.mxu1 %v657_v59 }
  0xdc   :  { %v161_v60 = vpop.f32.mrf.mxu0  ;;  %659 = vmatpush3.msra.mxu0 %v657_v59  ;;  %700 = vmatpush3.msra.mxu1 %v657_v59 }
  0xdd   :  { %660 = vmatprep.subr.mxu0 %v161_v60  ;;  %693 = vmatprep.subr.mxu1 %v161_v60 }
  0xde   :  { %661 = vmatpush3.msra.mxu0 %v161_v60  ;;  %701 = vmatpush3.msra.mxu1 %v161_v60 }
  0xdf   :  { %662 = vmatprep.subr.mxu0 %v654_v57  ;;  %694 = vmatprep.subr.mxu1 %v654_v57 }
  0xe0   :  { %663 = vmatpush3.msra.mxu0 %v654_v57  ;;  %702 = vmatpush3.msra.mxu1 %v654_v57  ;;  %v525_v57 = vmul.f32 %v841_v4, %v841_v4 }
  0xe1   :  { %664 = vmatprep.subr.mxu0 %v151_v58  ;;  %695 = vmatprep.subr.mxu1 %v151_v58 }
  0xe2   :  { %665 = vmatpush3.msra.mxu0 %v151_v58  ;;  %703 = vmatpush3.msra.mxu1 %v151_v58 }
  0xe3   :  { %666 = vmatprep.subr.mxu0 %v651_v55  ;;  %696 = vmatprep.subr.mxu1 %v651_v55 }
  0xe4   :  { %667 = vmatpush3.msra.mxu0 %v651_v55  ;;  %704 = vmatpush3.msra.mxu1 %v651_v55 }
  0xe5   :  { %668 = vmatprep.subr.mxu0 %v141_v56  ;;  %697 = vmatprep.subr.mxu1 %v141_v56 }
  0xe6   :  { %669 = vmatpush3.msra.mxu0 %v141_v56  ;;  %705 = vmatpush3.msra.mxu1 %v141_v56 }
  0xe7   :  { %670 = vmatprep.subr.mxu0 %v648_v53  ;;  %698 = vmatprep.subr.mxu1 %v648_v53 }
  0xe8   :  { %671 = vmatpush3.msra.mxu0 %v648_v53  ;;  %706 = vmatpush3.msra.mxu1 %v648_v53 }
  0xe9   :  { %672 = vmatprep.subr.mxu0 %v131_v54  ;;  %699 = vmatprep.subr.mxu1 %v131_v54 }
  0xea   :  { %673 = vmatpush3.msra.mxu0 %v131_v54  ;;  %707 = vmatpush3.msra.mxu1 %v131_v54 }
  0xeb   :  { %675 = vmatmul.mubr.msk.f32.vlgmr.msra.gmra.mxu0 %vm256_vm1, %v576_v52  ;;  %678 = vmatmul.mubr.msk.f32.vlgmr.msra.gmra.mxu1 %vm256_vm1, %v926_v35 }
  0xec   :  { %680 = vmatprep.mubr.msk.f32.mxu1 %vm256_vm1, %v923_v32 }
  0xef   :  { %681 = vmatmul.mubr.msk.f32.gmra.mxu1 %vm256_vm1, %v928_v36 }
  0xf0   :  { %683 = vmatprep.mubr.msk.f32.mxu1 %vm256_vm1, %v930_v39 }
  0xf3   :  { %684 = vmatmul.mubr.msk.f32.gmra.mxu1 %vm256_vm1, %v932_v40 }
  0xf4   :  { %686 = vmatprep.mubr.msk.f32.mxu1 %vm256_vm1, %v583_v43 }
  0xf7   :  { %687 = vmatmul.mubr.msk.f32.gmra.mxu1 %vm256_vm1, %v584_v44 }
  0xf8   :  { %689 = vmatprep.mubr.msk.f32.mxu1 %vm256_vm1, %v585_v47 }
  0xfb   :  { %690 = vmatmul.mubr.msk.f32.gmra.mxu1 %vm256_vm1, %v586_v48 }
 0x1ab   :  { %v679_v61 = vpop.f32.mrf.mxu1  ;;  %v676_v13 = vpop.f32.mrf.mxu0 }
 0x1ad   :  { %v369_v62 = vpop.f32.mrf.mxu1  ;;  %v359_v16 = vpop.f32.mrf.mxu0 }
 0x1af   :  { %v682_v63 = vpop.f32.mrf.mxu1 }
 0x1b1   :  { %v379_v0 = vpop.f32.mrf.mxu1 }
 0x1b3   :  { %v685_v2 = vpop.f32.mrf.mxu1 }
 0x1b4   :  { %v419_v14 = vmul.f32 %v685_v2, %v676_v13 }
 0x1b5   :  { %v389_v3 = vpop.f32.mrf.mxu1 }
 0x1b6   :  { %v418_v17 = vmul.f32 %v389_v3, %v359_v16 }
 0x1b7   :  { %v688_v5 = vpop.f32.mrf.mxu1 }
 0x1b8   :  { %v421_v18 = vmul.f32 %v688_v5, %v679_v61 }
 0x1b9   :  { %v399_v6 = vpop.f32.mrf.mxu1 }
 0x1ba   :  { %v420_v15 = vmul.f32 %v399_v6, %v369_v62 }
 0x1bb   :  { %v691_v8 = vpop.f32.mrf.mxu1 }
 0x1bc   :  { %v423_v9 = vmul.f32 %v691_v8, %v682_v63 }
 0x1bd   :  { %v409_v11 = vpop.f32.mrf.mxu1 }
 0x1be   :  { %v422_v12 = vmul.f32 %v409_v11, %v379_v0  ;;  %434 = vadd.xlane.f32.xlu1 %v423_v9 }
 0x1c0   :  { %432 = vadd.xlane.f32.xlu0 %v422_v12 }
 0x1c2   :  { %426 = vadd.xlane.f32.xlu1 %v419_v14 }
 0x1c4   :  { %428 = vadd.xlane.f32.xlu0 %v420_v15 }
 0x1c6   :  { %499 = vadd.xlane.f32.xlu1 %v498_v21 }
 0x1c8   :  { %424 = vadd.xlane.f32.xlu0 %v418_v17 }
 0x1cc   :  { %430 = vadd.xlane.f32.xlu0 %v421_v18 }
 0x247   :  { %v435_v22 = vpop.xlane.xlu1 %434 }
 0x248   :  { %v442_v23 = vsub.f32 0.0, %v435_v22 }
 0x249   :  { %v433_v24 = vpop.xlane.xlu0 %432 }
 0x24a   :  { %v443_v25 = vmul.f32 1.442695, %v442_v23  ;;  %v436_v26 = vsub.f32 0.0, %v433_v24 }
 0x24b   :  { %v427_v38 = vpop.xlane.xlu1 %426 }
 0x24c   :  { %724 = vpow2.f32 %v443_v25  ;;  %v437_v27 = vmul.f32 1.442695, %v436_v26 }
 0x24d   :  { %v429_v10 = vpop.xlane.xlu0 %428 }
 0x24e   :  { %726 = vpow2.f32 %v437_v27 }
 0x24f   :  { %v500_v58 = vpop.xlane.xlu1 %499 }
 0x250   :  { %v501_v61 = vrot.slane %v500_v58, 4 }
 0x251   :  { %v425_v32 = vpop.xlane.xlu0 %424 }
 0x252   :  { %v502_v0 = vadd.f32 %v501_v61, %v500_v58 }
 0x254   :  { %v503_v6 = vrot.slane %v502_v0, 2 }
 0x255   :  { %v431_v39 = vpop.xlane.xlu0 %430 }
 0x256   :  { %v504_v15 = vadd.f32 %v503_v6, %v502_v0 }
 0x258   :  { %v505_v22 = vrot.slane %v504_v15, 1 }
 0x259   :  { %v725_v28 = vpop.eup %724 }
 0x25a   :  { %v445_v29 = vadd.f32 1.0, %v725_v28  ;;  %v506_v27 = vadd.f32 %v505_v22, %v504_v15 }
 0x25b   :  { %v727_v30 = vpop.eup %726 }
 0x25c   :  { %v439_v31 = vadd.f32 1.0, %v727_v30  ;;  %728 = vrcp.f32 %v445_v29 }
 0x25e   :  { %730 = vrcp.f32 %v439_v31 }
 0x269   :  { %v729_v33 = vpop.eup %728 }
 0x26a   :  { %v451_v41 = vmul.f32 %v729_v33, %v431_v39 }
 0x26b   :  { %v731_v7 = vpop.eup %730 }
 0x26c   :  { %v448_v34 = vmul.f32 %v731_v7, %v429_v10  ;;  %v477_v35 = vsub.f32 %v731_v7, %v729_v33 }
 0x26e   :  { %v449_v36 = vadd.f32 %v448_v34, %v425_v32  ;;  %v599_v37 = vadd.f32 -0.1, %v477_v35 }
 0x270   :  { %v450_v40 = vsub.f32 %v449_v36, %v427_v38  ;;  %v479_v42 = vmax.f32 %v599_v37, 0.0 }
 0x272   :  { %v452_v43 = vsub.f32 %v450_v40, %v451_v41  ;;  %v480_v44 = vsel %vm463_vm14, %v479_v42, 0.0 }
 0x273   :  { %481 = vadd.xlane.f32.xlu0 %v480_v44 }
 0x274   :  { %v453_v46 = vsub.f32 0.0, %v452_v43 }
 0x276   :  { %v455_v47 = vand.u32 2147483647, %v453_v46  ;;  %v454_v53 = vmax.f32 %v453_v46, 0.0 }
 0x277   :  { %512 = vadd.xlane.f32.xlu0 %v511_v45 }
 0x278   :  { %v456_v48 = vsub.f32 0.0, %v455_v47 }
 0x27a   :  { %v457_v49 = vmul.f32 1.442695, %v456_v48 }
 0x27c   :  { %732 = vpow2.f32 %v457_v49 }
 0x289   :  { %v733_v50 = vpop.eup %732 }
 0x28a   :  { %v459_v51 = vadd.f32 1.0, %v733_v50 }
 0x28c   :  { %734 = vlog2.f32 %v459_v51 }
 0x299   :  { %v735_v52 = vpop.eup %734 }
 0x29a   :  { %v461_v54 = vmul.f32 0.6931472, %v735_v52 }
 0x29c   :  { %v462_v55 = vadd.f32 %v461_v54, %v454_v53 }
 0x29e   :  { %v464_v56 = vsel %vm463_vm14, %v462_v55, 0.0 }
 0x29f   :  { %465 = vadd.xlane.f32.xlu1 %v464_v56 }
 0x2a3   :  { %526 = vadd.xlane.f32.xlu1 %v525_v57 }
 0x2fc   :  { %v482_v1 = vpop.xlane.xlu0 %481 }
 0x2fd   :  { %v483_v60 = vrot.slane %v482_v1, 4 }
 0x2ff   :  { %v484_v63 = vadd.f32 %v483_v60, %v482_v1 }
 0x300   :  { %v513_v59 = vpop.xlane.xlu0 %512 }
 0x301   :  { %v514_v62 = vrot.slane %v513_v59, 4  ;;  %v485_v3 = vrot.slane %v484_v63, 2 }
 0x303   :  { %v515_v2 = vadd.f32 %v514_v62, %v513_v59  ;;  %v486_v13 = vadd.f32 %v485_v3, %v484_v63 }
 0x305   :  { %v516_v9 = vrot.slane %v515_v2, 2  ;;  %v487_v19 = vrot.slane %v486_v13, 1 }
 0x307   :  { %v517_v16 = vadd.f32 %v516_v9, %v515_v2  ;;  %v488_v26 = vadd.f32 %v487_v19, %v486_v13 }
 0x309   :  { %v518_v23 = vrot.slane %v517_v16, 1 }
 0x30b   :  { %v519_v29 = vadd.f32 %v518_v23, %v517_v16 }
 0x328   :  { %v466_v5 = vpop.xlane.xlu1 %465 }
 0x329   :  { %v467_v8 = vrot.slane %v466_v5, 4 }
 0x32b   :  { %v468_v11 = vadd.f32 %v467_v8, %v466_v5 }
 0x32c   :  { %v527_v12 = vpop.xlane.xlu1 %526 }
 0x32d   :  { %v469_v14 = vrot.slane %v468_v11, 2  ;;  %v528_v4 = vrot.slane %v527_v12, 4 }
 0x32f   :  { %v529_v17 = vadd.f32 %v528_v4, %v527_v12  ;;  %v470_v18 = vadd.f32 %v469_v14, %v468_v11 }
 0x331   :  { %v530_v20 = vrot.slane %v529_v17, 2  ;;  %v471_v21 = vrot.slane %v470_v18, 1 }
 0x333   :  { %v531_v24 = vadd.f32 %v530_v20, %v529_v17  ;;  %v472_v25 = vadd.f32 %v471_v21, %v470_v18 }
 0x335   :  { %708 = vpush %v472_v25  ;;  %v532_v28 = vrot.slane %v531_v24, 1 }
 0x336   :  { %710 = vpush %v488_v26 }
 0x337   :  { %712 = vpush %v506_v27  ;;  %v533_v30 = vadd.f32 %v532_v28, %v531_v24 }
 0x338   :  { %714 = vpush %v519_v29 }
 0x339   :  { %716 = vpush %v533_v30 }
 0x366   :  { %s709_s0 = spop %708 }
 0x367   :  { %s711_s1 = spop %710  ;;  %v474_v31 = vstv %s709_s0 }
 0x368   :  { %v490_v10 = vstv %s711_s1  ;;  %s713_s21 = spop %712  ;;  %v476_v35 = vmul.f32 0.125, %v474_v31 }
 0x369   :  { %v491_v32 = vmul.f32 0.125, %v490_v10  ;;  %v508_v33 = vstv %s713_s21  ;;  %s715_s22 = spop %714 }
 0x36a   :  { %v510_v7 = vmul.f32 0.00048828125, %v508_v33  ;;  %v521_v34 = vstv %s715_s22  ;;  %s717_s2 = spop %716 }
 0x36b   :  { %v492_v36 = vmul.f32 0.5, %v491_v32  ;;  %v523_v37 = vmul.f32 0.0009765625, %v521_v34  ;;  %v535_v38 = vstv %s717_s2 }
 0x36c   :  { %v536_v39 = vmul.f32 0.0009765625, %v535_v38 }
 0x36d   :  { %v524_v40 = vadd.f32 %v523_v37, %v510_v7  ;;  %v493_v41 = vadd.f32 %v492_v36, %v476_v35 }
 0x36f   :  { %v537_v42 = vadd.f32 %v536_v39, %v524_v40  ;;  %495 = vst.msk [vmem:[#allocation2] sm:$0x1] %vm494_vm15, %v493_v41 }
 0x370   :  { %747 = shalt.err (!%p744_p4)
}
 0x371   :  { %548 = dma.vmem_to_hbm [thread:$0]  %s546_s24, 16, %s974_s6, [#allocation3]   ;;  %538 = vst.msk [vmem:[#allocation4] sm:$0x1] %vm494_vm15, %v537_v42 }
 0x372   :  { %s756_s30 = scalar_lea.vmem %s556_s26, 16  ;;  %s760_s3 = scalar_lea.vmem %s556_s26, 32 }
 0x373   :  { %p757_p5 = scmp.ne.s32.totalorder %s556_s26, %s756_s30  ;;  %p761_p6 = scmp.lt.s32.totalorder %s556_s26, %s556_s26 }
 0x374   :  { %p762_p7 = scmp.lt.s32.totalorder %s760_s3, %s756_s30 }
 0x376   :  { %p763_p8 = por %p762_p7, %p761_p6 }
 0x378   :  { %p764_p9 = pnand %p763_p8, %p757_p5 }
 0x37a   :  { %767 = shalt.err (!%p764_p9)
}
 0x37b   :  { %558 = dma.vmem_to_hbm [thread:$0]  %s556_s26, 16, %s975_s7, [#allocation5]  }
 0x37c   :  { %776 = dma.done.wait [#allocation3], 16  }
 0x37d   :  { %777 = vsyncadd [#allocation3], 4294967280 }
 0x37e   :  { %778 = dma.done.wait [#allocation5], 16  }
 0x37f   :  { %779 = vsyncadd [#allocation5], 4294967280 }
 0x380   :  { %565 = vsyncpa [#allocation3], 1 }
 0x381   :  { %566 = vsyncpa [#allocation5], 1 }

</bundles_post_ra>
